<compile_context>
chip_gen: v6e
topology: v6e:2x2x1
jax: 0.10.0
libtpu: 0.0.40
codegen_flags: <defaults>
</compile_context>

<pallas_src>
import functools

import jax
import jax.numpy as jnp
from jax.experimental import pallas as pl
from jax.experimental.pallas import tpu as pltpu


def _round_up(v: int, m: int) -> int:
    return ((v + m - 1) // m) * m


def _sublane_count(dtype) -> int:
    # Minimal sublane tiling: 8 rows for 32-bit, 16 for 16-bit, 32 for 8-bit.
    bits = jnp.dtype(dtype).itemsize * 8
    return max(8, (8 * 32) // bits)


def _pick_channel_block(n: int, ch: int, cap: int, min_blocks: int) -> int:
    """Largest divisor of `ch` that fits `cap` and (if possible) keeps the
    grid at >= min_blocks blocks for pipelining / megacore sharding."""
    cap = max(1, cap)
    divisors = [d for d in range(1, ch + 1) if ch % d == 0 and d <= cap]
    good = [d for d in divisors if n * (ch // d) >= min_blocks]
    return max(good) if good else max(divisors)


def _crop_dma_kernel(x_hbm, o_ref, copy_sem, *, cb, rows, cols, h_out, w_out):
    """Windowed DMA: copy only the cropped region HBM -> output VMEM block."""
    i = pl.program_id(0)   # batch index
    j = pl.program_id(1)   # channel-block index
    src = x_hbm.at[pl.ds(i, 1), pl.ds(j * cb, cb),
                   pl.ds(rows, h_out), pl.ds(cols, w_out)]
    cp = pltpu.make_async_copy(src, o_ref, copy_sem)
    cp.start()
    cp.wait()


def _crop_slice_kernel(x_ref, o_ref, *, rows, cols, h_out, w_out):
    """Fallback for tiny rows: static in-VMEM slice of the full block."""
    o_ref[...] = x_ref[:, :, rows:rows + h_out, cols:cols + w_out]


def crop_layer(x: jnp.ndarray, crop_set=(-1, -2), *,
               vmem_budget_bytes: int = 16 * 1024 * 1024,
               vmem_limit_bytes: int = 48 * 1024 * 1024,
               min_grid_blocks: int = 4,
               dma_min_row_bytes: int = 512,
               force_windowed_dma=None) -> jnp.ndarray:
    """Pallas implementation of CropLayer.forward for NCHW input."""
    rows = -int(crop_set[0])
    cols = -int(crop_set[1])
    # Like the PyTorch slice `[0:-0]`, a crop of 0 would produce an empty
    # tensor; require strictly positive crops (the module's real use case).
    assert rows > 0 and cols > 0

    n, ch, h, w = x.shape
    h_out = h - 2 * rows
    w_out = w - 2 * cols
    assert h_out > 0 and w_out > 0

    itemsize = jnp.dtype(x.dtype).itemsize
    sub = _sublane_count(x.dtype)

    if force_windowed_dma is None:
        use_dma = (w_out * itemsize) >= dma_min_row_bytes
    else:
        use_dma = bool(force_windowed_dma)

    # Padded VMEM bytes per channel (lane dim -> 128, sublane dim -> dtype tile).
    out_pad = _round_up(h_out, sub) * _round_up(w_out, 128) * itemsize
    in_pad = _round_up(h, sub) * _round_up(w, 128) * itemsize
    per_channel = out_pad if use_dma else (in_pad + out_pad)

    cap = min(ch, max(1, vmem_budget_bytes // per_channel))
    cb = _pick_channel_block(n, ch, cap, min_grid_blocks)
    grid = (n, ch // cb)

    out_shape = jax.ShapeDtypeStruct((n, ch, h_out, w_out), x.dtype)
    out_bytes = n * ch * h_out * w_out * itemsize
    in_bytes = out_bytes if use_dma else n * ch * h * w * itemsize

    out_spec = pl.BlockSpec((1, cb, h_out, w_out), lambda i, j: (i, j, 0, 0))
    compiler_params = pltpu.CompilerParams(
        dimension_semantics=("parallel", "parallel"),
        vmem_limit_bytes=vmem_limit_bytes,
    )
    cost = pl.CostEstimate(flops=0, transcendentals=0,
                           bytes_accessed=in_bytes + out_bytes)

    if use_dma:
        kernel = functools.partial(
            _crop_dma_kernel, cb=cb, rows=rows, cols=cols,
            h_out=h_out, w_out=w_out)
        grid_spec = pltpu.PrefetchScalarGridSpec(
            num_scalar_prefetch=0,
            grid=grid,
            in_specs=[pl.BlockSpec(memory_space=pl.ANY)],
            out_specs=out_spec,
            scratch_shapes=[pltpu.SemaphoreType.DMA],
        )
    else:
        kernel = functools.partial(
            _crop_slice_kernel, rows=rows, cols=cols,
            h_out=h_out, w_out=w_out)
        grid_spec = pltpu.PrefetchScalarGridSpec(
            num_scalar_prefetch=0,
            grid=grid,
            in_specs=[
                # Last two block dims equal the full (H, W) extents -> no
                # (8, 128) tiling violation regardless of crop size.
                pl.BlockSpec((1, cb, h, w), lambda i, j: (i, j, 0, 0)),
            ],
            out_specs=out_spec,
        )

    return pl.pallas_call(
        kernel,
        out_shape=out_shape,
        grid_spec=grid_spec,
        compiler_params=compiler_params,
        cost_estimate=cost,
    )(x)


if __name__ == "__main__":
    key = jax.random.PRNGKey(0)
    # Small NCHW input consistent with the module's conv-style usage.
    x = jax.random.normal(key, (2, 4, 16, 16), dtype=jnp.float32)

    crop_set = (-1, -2)  # rows_to_crop=1, cols_to_crop=2
    r, c = -crop_set[0], -crop_set[1]
    ref = x[:, :, r:-r, c:-c]

    # 1) Default path (auto-selects the fallback for these tiny 48 B rows).
    out = jax.block_until_ready(crop_layer(x, crop_set))
    assert out.shape == (2, 4, 14, 12), out.shape
    assert out.dtype == x.dtype
    assert jnp.array_equal(out, ref), "default path mismatch vs reference"

    # 2) Force the windowed-DMA path (correct at any size) to exercise it.
    out_dma = jax.block_until_ready(
        crop_layer(x, crop_set, force_windowed_dma=True))
    assert jnp.array_equal(out_dma, ref), "DMA path mismatch vs reference"

    # 3) Force the in-VMEM slice fallback path explicitly.
    out_slc = jax.block_until_ready(
        crop_layer(x, crop_set, force_windowed_dma=False))
    assert jnp.array_equal(out_slc, ref), "slice path mismatch vs reference"

    # 4) Wider input that naturally takes the DMA path, with a channel count
    #    whose chosen block (a divisor of C) splits into multiple grid blocks.
    x2 = jax.random.normal(jax.random.PRNGKey(0), (2, 6, 16, 256),
                           dtype=jnp.float32)
    out2 = jax.block_until_ready(crop_layer(x2, (-2, -3)))
    ref2 = x2[:, :, 2:-2, 3:-3]
    assert out2.shape == (2, 6, 12, 250), out2.shape
    assert jnp.array_equal(out2, ref2), "wide DMA path mismatch vs reference"

    print("KERNEL_OK")
</pallas_src>

<mosaic_0001>
module attributes {stable_mosaic.version = 11 : i64} {
  func.func @_crop_slice_kernel(%arg0: i32, %arg1: i32, %arg2: memref<1x2x16x16xf32, #tpu.memory_space<vmem>>, %arg3: memref<1x2x14x12xf32, #tpu.memory_space<vmem>>) attributes {dimension_semantics = [#tpu.dimension_semantics<parallel>, #tpu.dimension_semantics<parallel>], iteration_bounds = array<i64: 2, 2>, scalar_prefetch = 0 : i64, scratch_operands = 0 : i64, tpu.core_type = #tpu.core_type<tc>, window_params = [{transform_indices = @transform_0, window_bounds = array<i64: 1, 2, 16, 16>}, {transform_indices = @transform_1, window_bounds = array<i64: 1, 2, 14, 12>}]} {
    %c0 = arith.constant 0 : index
    %c0_0 = arith.constant 0 : index
    %c1 = arith.constant 1 : index
    %c2 = arith.constant 2 : index
    %0 = vector.load %arg2[%c0, %c0_0, %c1, %c2] : memref<1x2x16x16xf32, #tpu.memory_space<vmem>>, vector<1x2x14x12xf32>
    %c0_1 = arith.constant 0 : index
    %c0_2 = arith.constant 0 : index
    %c0_3 = arith.constant 0 : index
    %c0_4 = arith.constant 0 : index
    %1 = vector.load %arg3[%c0_1, %c0_2, %c0_3, %c0_4] : memref<1x2x14x12xf32, #tpu.memory_space<vmem>>, vector<1x2x14x12xf32>
    tpu.vector_store %arg3[%c0_1, %c0_2, %c0_3, %c0_4], %0 {strides = array<i32>} : memref<1x2x14x12xf32, #tpu.memory_space<vmem>>, vector<1x2x14x12xf32>,
    return
  }
  func.func @transform_0(%arg0: i32, %arg1: i32) -> (i32, i32, i32, i32) {
    %c0_i32 = arith.constant 0 : i32
    %c0_i32_0 = arith.constant 0 : i32
    %c0_i32_1 = arith.constant 0 : i32
    return %arg0, %arg1, %c0_i32, %c0_i32_0 : i32, i32, i32, i32
  }
  func.func @transform_1(%arg0: i32, %arg1: i32) -> (i32, i32, i32, i32) {
    %c0_i32 = arith.constant 0 : i32
    %c0_i32_0 = arith.constant 0 : i32
    %c0_i32_1 = arith.constant 0 : i32
    return %arg0, %arg1, %c0_i32, %c0_i32_0 : i32, i32, i32, i32
  }
}

</mosaic_0001>

<bundles_post_ra>
// kernel: tpu_custom_call.1
= control target key start
LH: loop header
LB: loop body
LE: loop exit
PB: predicated region body
PF: predicated region fallthrough
CT: control target
= control target key end

     0   :  { %6 = vsyncpa [#allocation3], 0  ;;  %s624_s0 = inlined_call_operand.hbm [shape: f32[2,4,16,16], index: 0, kind: input, shape index: {}]   ;;  %s625_s1 = inlined_call_operand.vmem [shape: f32[2,4,14,12], index: 1, kind: output, shape index: {}]  }
   0x1   :  { %8 = vsyncpa [#allocation3 + $0x1], 0  ;;  %s500_s6 = smov 0   ;;  %s502_s7 = smov 0  }
   0x2   :  { %s504_s8 = smov 0   ;;  %s506_s9 = smov 0  }
   0x3   :  { %s508_s10 = smov 0   ;;  %s510_s11 = smov 0  }
   0x4   :  { %s512_s12 = smov 0   ;;  %s514_s13 = smov 0  }
   0x5 LB: > { %s298_s14 = sadd.s32 4294967295, %s484_s13   ;;  %s23_s15 = sadd.s32 1, %s476_s11  ;;  %s484_s13 = sphi %s514_s13, %s14_s13   ;;  %s480_s12 = sphi %s512_s12, %s635_s12   ;;  %s476_s11 = sphi %s510_s11, %s634_s11   ;;  %s472_s10 = sphi %s508_s10, %s633_s10   ;;  %s468_s9 = sphi %s506_s9, %s632_s9   ;;  %s464_s8 = sphi %s504_s8, %s631_s8   ;;  %s460_s7 = sphi %s502_s7, %s630_s7   ;;  %s456_s6 = sphi %s500_s6, %s629_s6  }
   0x6   : > { %p24_p0 = scmp.ge.s32.totalorder %s23_s15, 2  ;;  %s26_s16 = sadd.s32 1, %s480_s12 }
   0x7   : > { %s35_s17 = sadd.s32 1, %s464_s8  ;;  %p42_p1 = scmp.ne.s32.totalorder %s464_s8, %s460_s7 }
   0x8   : > { %s637_s15 = smov (%p24_p0, %s23_s15), 0  ;;  %s639_s16 = smov (!%p24_p0, %s26_s16), %s480_s12 }
   0x9   : > { %s31_s18 = ssub.s32 %s476_s11, %s637_s15  ;;  %p43_p2 = scmp.eq.s32.totalorder %s484_s13, 0 }
   0xa   : > { %p28_p3 = scmp.ge.s32.totalorder %s639_s16, 2  ;;  %p48_p4 = scmp.ne.s32.totalorder %s460_s7, %s456_s6 }
   0xb   : > { %p551_p5 = por %p43_p2, %p42_p1  ;;  %p49_p6 = scmp.eq.s32.totalorder %s298_s14, 0 }
   0xc   : > { %s641_s16 = smov (%p28_p3, %s639_s16), 0  ;;  %p322_p8 = scmp.lt.s32.totalorder %s484_s13, 4 }
   0xd   : > { %p557_p7 = por %p49_p6, %p48_p4  ;;  %s30_s21 = ssub.s32 %s480_s12, %s641_s16 }
   0xe   : > { %s32_s22 = sor.u32 %s31_s18, %s30_s21  ;;  %s100_s23 = sand.u32 1, %s464_s8  }
   0xf   : > { %p33_p9 = scmp.eq.s32.totalorder %s32_s22, 0  ;;  %s302_s24 = sshll.u32 %s100_s23, 5 }
  0x10   : > { %s315_s25 = sshll.u32 %s476_s11, 2  ;;  %s305_s27 = sshll.u32 %s480_s12, 3 }
  0x11   : > { %s567_s26 = scalar_select %p33_p9, %s464_s8, %s35_s17  }
  0x12   : > { %s111_s28 = sadd.s32 %s315_s25, %s305_s27  ;;  %s104_s29 = scalar_lea.vmem [#allocation2], %s302_s24 }
  0x13   : > { %s114_s30 = sshll.u32 %s104_s29, 4  ;;  %s306_s2 = sshll.u32 %s111_s28, 7  ;;  %s115_s30 = int_to_ptr.vmem [resolvable:$true] %s114_s30 }
  0x14   : > { %s113_s5 = scalar_lea.hbm %s624_s0, %s306_s2  ;;  %p577_p10 = pnand %p322_p8, %p551_p5 }
  0x15   : > { %p307_p11 = scmp.ge.s32.totalorder %s484_s13, 1  ;;  %s101_s14 = scalar_lea.sflag [#allocation3], %s100_s23 }
  0x16   : > { %p392_p12 = pneg %p577_p10  ;;  %s403_s17 = scalar_lea.vmem %s115_s30, 512 }
  0x17   : > { %p404_p13 = scmp.ne.s32.totalorder %s115_s30, %s403_s17  ;;  %s486_s18 = smov [#allocation2]  }
  0x18   : > { %s408_s21 = sshll.u32 %s486_s18, 4  ;;  %s409_s21 = int_to_ptr.vmem [resolvable:$false] %s408_s21 }
  0x19   : > { %p406_p0 = pnand %p404_p13, %p392_p12  ;;  %s410_s22 = scalar_lea.vmem %s409_s21, 1024 }
  0x1a   : > { %p411_p2 = scmp.lt.s32.totalorder %s115_s30, %s409_s21  ;;  %p412_p3 = scmp.lt.s32.totalorder %s410_s22, %s403_s17 }
  0x1b   : > { %p407_p1 = pneg %p406_p0 }
  0x1c   : > { %p413_p4 = por %p412_p3, %p411_p2 }
  0x1e   : > { %p414_p5 = pnand %p413_p4, %p407_p1 }
  0x20   : > { %417 = shalt.err (!%p414_p5)
}
  0x21   : > { %s487_s19 = smov 128   ;;  %s488_s23 = smov 8  }
  0x22   : > { %321 = dma.hbm_to_vmem [thread:$0]  (!%p577_p10), %s113_s5, 512, %s115_s30, %s101_s14, %s487_s19, %s487_s19, %s488_s23  }
  0x23   : > { %p122_p6 = scmp.lt.s32.totalorder %s484_s13, 5 }
  0x25   : > { %p123_p8 = pnand %p307_p11, %p122_p6 }
  0x26   : > { %s128_s24 = sand.u32 (!%p123_p8), 1, %s460_s7  }
  0x27   : > { %126 = sbr.rel (%p123_p8) target bundleno = 166 (0xa6), region = 24  ;;  %s308_s25 = sshll.u32 (!%p123_p8), %s128_s24, 5 }
  0x28   : > { %s129_s27 = scalar_lea.sflag (!%p123_p8), [#allocation3], %s128_s24  ;;  %s132_s28 = scalar_lea.vmem (!%p123_p8), [#allocation2], %s308_s25 }
  0x2c   : > { %451 = dma.done.wait (%p557_p7), %s129_s27, 512  }
  0x2d   : > { %453 = vsyncadd (%p557_p7), %s129_s27, 4294966784  ;;  %v170_v0 = vld [vmem:[%s132_s28 + $0x11] sm:$0xff]  ;;  %v168_v1 = vld [vmem:[%s132_s28 + $0x1] sm:$0xff]  ;;  %s489_s29 = smov 126   ;;  %s309_s30 = sshll.u32 %s468_s9, 1  ;;  %vm188_vm0 = vcmask 97280  }
  0x2e   : > { %180 = vrot.lane.b32.xlu1 %v170_v0, %s489_s29  ;;  %176 = vrot.lane.b32.xlu0 %v168_v1, %s489_s29  ;;  %v171_v2 = vld [vmem:[%s132_s28 + $0x19] sm:$0x3f]  ;;  %v169_v3 = vld [vmem:[%s132_s28 + $0x9] sm:$0x3f]  ;;  %p158_p9 = scmp.lt.s32.totalorder %s472_s10, 1  ;;  %p160_p10 = scmp.lt.s32.totalorder %s309_s30, 3 }
  0x2f   : > { %vm190_vm1 = vcmask 95232  }
  0x30   : > { %s643_s10 = smov (!%p158_p9, %s472_s10), 1  ;;  %s645_s30 = smov (!%p160_p10, %s309_s30), 3 }
  0x31   : > { %s310_s2 = sshll.u32 %s645_s30, 1  ;;  %s311_s20 = sshll.u32 %s643_s10, 3 }
  0x32   : > { %182 = vrot.lane.b32.xlu1 %v171_v2, %s489_s29  ;;  %178 = vrot.lane.b32.xlu0 %v169_v3, %s489_s29  ;;  %s164_s3 = sadd.s32 %s311_s20, %s310_s2 }
  0x33   : > { %s312_s4 = sshll.u32 %s164_s3, 3 }
  0x34   : > { %s166_s14 = scalar_lea.vmem %s625_s1, %s312_s4 }
  0xa0   : > { %v181_v4 = vpop.permute.xlu1 %180  ;;  %v177_v5 = vpop.permute.xlu0 %176 }
  0xa1   : > { %192 = vst.msk [vmem:[%s166_s14 + $0x10] sm:$0xff] %vm188_vm0, %v181_v4  ;;  %189 = vst.msk [vmem:[%s166_s14] sm:$0xff] %vm188_vm0, %v177_v5 }
  0xa4   : > { %v183_v6 = vpop.permute.xlu1 %182  ;;  %v179_v7 = vpop.permute.xlu0 %178 }
  0xa5   : > { %193 = vst.msk [vmem:[%s166_s14 + $0x18] sm:$0x3f] %vm190_vm1, %v183_v6  ;;  %191 = vst.msk [vmem:[%s166_s14 + $0x8] sm:$0x3f] %vm190_vm1, %v179_v7 }
  0xa6 PF: > { %s14_s13 = sadd.s32 1, %s484_s13   ;;  %s629_s6 = smov %s460_s7 }
  0xa7   : > { %p11_p7 = scmp.ge.s32.totalorder %s14_s13, 6   ;;  %s630_s7 = smov %s464_s8 }
  0xa8   : > { %s631_s8 = smov %s567_s26  ;;  %s632_s9 = smov %s476_s11 }
  0xa9   : > { %s633_s10 = smov %s480_s12  ;;  %s634_s11 = smov %s637_s15 }
  0xaa   : > { %s635_s12 = smov %s641_s16  ;;  %13 = sbr.rel (!%p11_p7) target bundleno = 5 (0x5), region = 64 }
  0xaf   :  { %226 = vsyncpa [#allocation3], 1 }
  0xb0   :  { %228 = vsyncpa [#allocation3 + $0x1], 1 }

</bundles_post_ra>
